<compile_context>
chip_gen: v5e
topology: v5e:2x2
jax: 0.10.0
libtpu: 0.0.40
codegen_flags: <defaults>
</compile_context>

<pallas_src>
import jax
import jax.numpy as jnp
from jax.experimental import pallas as pl
from jax.experimental.pallas import tpu as pltpu


def _round_up(x, m):
    return (x + m - 1) // m * m


# ------------------------------------------------------------------ kernel ---------

def _rgcn_kernel(a_ref, xw_ref, invdeg_ref, bias_ref, o_ref, acc_ref):
    # grid = (dst_tile [parallel], relation [arbitrary], src_tile [arbitrary])
    r = pl.program_id(1)
    s = pl.program_id(2)
    last_r = pl.num_programs(1) - 1
    last_s = pl.num_programs(2) - 1

    @pl.when(jnp.logical_and(r == 0, s == 0))
    def _init_out():
        o_ref[...] = jnp.zeros_like(o_ref)

    @pl.when(s == 0)
    def _init_acc():
        acc_ref[...] = jnp.zeros_like(acc_ref)

    # A stored as int8 {0,1}: exact upcast to bf16; VPU work hides under the A DMA.
    a = a_ref[0].astype(jnp.bfloat16)          # (tile_d, tile_s)
    xw = xw_ref[0]                             # (tile_s, out_pad) bf16 == (X @ W_r) tile

    # Reassociated message passing: pure MXU accumulation over src tiles (f32 acc).
    acc_ref[...] += jnp.dot(a, xw, preferred_element_type=jnp.float32)

    @pl.when(s == last_s)
    def _finish_relation():
        # norm='right': scale the finished per-relation partial by 1/max(in_deg_r, 1)
        # (r-dependent) BEFORE summing into the cross-relation accumulator.
        o_ref[...] += acc_ref[...] * invdeg_ref[0]

    @pl.when(jnp.logical_and(r == last_r, s == last_s))
    def _finalize():
        o_ref[...] += bias_ref[...]
        # activation=None, self_loop=False, dropout=0.0, batchnorm=False (defaults).
        # TODO(synk): self_loop / activation / dropout / batchnorm paths omitted
        # (disabled by the module's defaults).


# ------------------------------------------------------------- graph preprocessing --

def _pick_tiles(n_dst, n_src, tile_d, tile_s):
    # A is stored as int8 -> native tile is (32, 128): keep tile_d a multiple of 32
    # and tile_s (the lane dim of the A block) a multiple of 128.
    tile_s = _round_up(min(tile_s, _round_up(n_src, 128)), 128)
    tile_d = _round_up(min(tile_d, _round_up(n_dst, 32)), 32)
    # v7x: the 'parallel' dst axis shards across 2 TensorCores -> want >= 2 dst tiles.
    if _round_up(n_dst, tile_d) // tile_d < 2 and tile_d > 32:
        tile_d = _round_up(tile_d // 2, 32)
    return tile_d, tile_s


def prepare_graph(adj, *, tile_d=1024, tile_s=1024):
    """One-time per-graph preprocessing (hoisted out of the per-layer call):
       * f32 1/max(in_deg, 1) computed from the un-padded adjacency (norm='right'),
       * adjacency padded to tile multiples and stored compactly as int8 {0,1}.
    adj: (R, n_dst, n_src) with 0/1 values (any float/int dtype)."""
    R, n_dst, n_src = adj.shape
    tile_d, tile_s = _pick_tiles(n_dst, n_src, tile_d, tile_s)
    n_dst_p = _round_up(n_dst, tile_d)
    n_src_p = _round_up(n_src, tile_s)

    # Full-row degree in f32 (exact up to 2^24 incident edges per row).
    deg = jnp.maximum(adj.astype(jnp.float32).sum(axis=-1, keepdims=True), 1.0)
    inv_deg = jnp.pad(1.0 / deg, ((0, 0), (0, n_dst_p - n_dst), (0, 0)))

    adj_i8 = jnp.pad(adj, ((0, 0), (0, n_dst_p - n_dst),
                           (0, n_src_p - n_src))).astype(jnp.int8)

    return {"adj": adj_i8, "inv_deg": inv_deg,
            "n_dst": n_dst, "n_src": n_src,
            "tile_d": tile_d, "tile_s": tile_s}


# ------------------------------------------------------------------ pallas wrapper --

def _rgcn_pallas(adj_i8, inv_deg, xw, bias, *, n_dst, n_src, tile_d, tile_s):
    """adj_i8: (R, n_dst_p, n_src_p) int8 {0,1}, pre-padded to tile multiples.
       inv_deg: (R, n_dst_p, 1) f32 = 1/max(in_deg, 1) over the REAL src columns.
       xw:      (R, n_src, out_feat) f32 = X @ W_r.   bias: (out_feat,)."""
    R, n_dst_p, n_src_p = adj_i8.shape
    out_feat = xw.shape[-1]

    # Lane-dense output; 256-wide once out_feat >= 256 (2x256x256 MXU on v6e/v7x).
    out_pad = _round_up(out_feat, 256 if out_feat >= 256 else 128)

    # (X @ W_r) cast to bf16 once, then padded (so the pad writes bf16 bytes).
    xw_p = jnp.pad(xw.astype(jnp.bfloat16),
                   ((0, 0), (0, n_src_p - n_src), (0, out_pad - out_feat)))
    bias_p = jnp.pad(bias.astype(jnp.float32),
                     (0, out_pad - out_feat)).reshape(1, out_pad)

    grid = (n_dst_p // tile_d, R, n_src_p // tile_s)

    # Explicit VMEM budget (v7x physical VMEM is 64 MiB; scoped default is 32 MiB).
    vmem_bytes = (2 * tile_d * tile_s * 1          # A tiles (int8, double-buffered)
                  + 2 * tile_s * out_pad * 2       # XW tiles (bf16)
                  + 2 * tile_d * 128 * 4           # inv_deg (lane dim padded to 128)
                  + 2 * tile_d * out_pad * 4       # resident output block
                  + tile_d * out_pad * 4           # per-relation f32 accumulator
                  + 2 * 8 * out_pad * 4)           # bias
    vmem_limit = int(min(max(vmem_bytes * 3 // 2, 32 * 1024 * 1024),
                         48 * 1024 * 1024))

    cost = pl.CostEstimate(
        flops=int(2 * R * n_dst_p * n_src_p * out_pad),
        transcendentals=0,
        bytes_accessed=int(adj_i8.size                 # A (int8), streamed once
                           + grid[0] * xw_p.size * 2   # XW re-streamed per dst tile
                           + inv_deg.size * 4
                           + n_dst_p * out_pad * 4))   # output writeback

    grid_spec = pltpu.PrefetchScalarGridSpec(
        num_scalar_prefetch=0,
        grid=grid,
        in_specs=[
            pl.BlockSpec((1, tile_d, tile_s), lambda d, r, s: (r, d, s)),    # A_r tile (int8)
            pl.BlockSpec((1, tile_s, out_pad), lambda d, r, s: (r, s, 0)),   # (X @ W_r) tile
            pl.BlockSpec((1, tile_d, 1), lambda d, r, s: (r, d, 0)),         # inv_deg tile
            pl.BlockSpec((1, out_pad), lambda d, r, s: (0, 0)),              # bias (resident)
        ],
        out_specs=pl.BlockSpec((tile_d, out_pad), lambda d, r, s: (d, 0)),   # resident accum
        scratch_shapes=[pltpu.VMEM((tile_d, out_pad), jnp.float32)],         # per-relation acc
    )

    out = pl.pallas_call(
        _rgcn_kernel,
        out_shape=jax.ShapeDtypeStruct((n_dst_p, out_pad), jnp.float32),
        grid_spec=grid_spec,
        compiler_params=pltpu.CompilerParams(
            dimension_semantics=("parallel", "arbitrary", "arbitrary"),
            vmem_limit_bytes=vmem_limit),
        cost_estimate=cost,
    )(adj_i8, xw_p, inv_deg, bias_p)

    return out[:n_dst, :out_feat]


# ------------------------------------------------------------------ layer functions -

def rel_graph_conv(adj_i8, inv_deg, x, weight, bias, *, n_dst, n_src, tile_d, tile_s):
    """Non-basis path: weight is (R, in_feat, out_feat)."""
    xw = jnp.einsum("si,rio->rso", x, weight)       # tiny reassociated glue matmul
    return _rgcn_pallas(adj_i8, inv_deg, xw, bias,
                        n_dst=n_dst, n_src=n_src, tile_d=tile_d, tile_s=tile_s)


def rel_graph_conv_basis(adj_i8, inv_deg, x, basis, coeff, bias, *,
                         n_dst, n_src, tile_d, tile_s):
    """Basis path (num_bases < num_rels): W_r = sum_b coeff[r,b] * basis[b]."""
    xb = jnp.einsum("si,bio->bso", x, basis)        # only B (not R) feature transforms
    xw = jnp.einsum("rb,bso->rso", coeff, xb)       # cheap recombination
    return _rgcn_pallas(adj_i8, inv_deg, xw, bias,
                        n_dst=n_dst, n_src=n_src, tile_d=tile_d, tile_s=tile_s)


def _xavier_uniform(key, shape, fan_in, fan_out, gain):
    bound = gain * (6.0 / (fan_in + fan_out)) ** 0.5
    return jax.random.uniform(key, shape, jnp.float32, -bound, bound)


# ------------------------------------------------------------------ demo / check ----

if __name__ == "__main__":
    # Small, deterministic synthetic problem (single node type).
    N = 64          # nodes
    IN_FEAT = 32
    OUT_FEAT = 32
    NUM_RELS = 3
    NUM_BASES = 2   # num_bases < num_rels -> exercises the WeightBasis path

    key = jax.random.PRNGKey(0)
    k_x, k_adj, k_basis, k_coeff = jax.random.split(key, 4)

    # node features
    x = jax.random.normal(k_x, (N, IN_FEAT), jnp.float32)

    # per-relation dense 0/1 adjacency (rows = dst, cols = src)
    adj = (jax.random.uniform(k_adj, (NUM_RELS, N, N)) < 0.1).astype(jnp.float32)

    # parameters (deterministic init mirroring the module's __init__)
    relu_gain = 2.0 ** 0.5
    basis = _xavier_uniform(k_basis, (NUM_BASES, IN_FEAT, OUT_FEAT),
                            IN_FEAT, OUT_FEAT, relu_gain)
    coeff = _xavier_uniform(k_coeff, (NUM_RELS, NUM_BASES),
                            NUM_BASES, NUM_RELS, relu_gain)
    h_bias = jnp.zeros((OUT_FEAT,), jnp.float32)     # nn.init.zeros_

    # One-time per-graph preprocessing (int8 padded adjacency + f32 inverse degrees).
    graph = prepare_graph(adj)

    fn = jax.jit(rel_graph_conv_basis,
                 static_argnames=("n_dst", "n_src", "tile_d", "tile_s"))
    out = jax.block_until_ready(
        fn(graph["adj"], graph["inv_deg"], x, basis, coeff, h_bias,
           n_dst=graph["n_dst"], n_src=graph["n_src"],
           tile_d=graph["tile_d"], tile_s=graph["tile_s"]))

    # ---- references ----
    weight = jnp.einsum("rb,bio->rio", coeff, basis)            # W_r from bases
    deg = jnp.maximum(adj.sum(axis=-1, keepdims=True), 1.0)     # (R, N, 1)

    # (1) exact-math reference at the kernel's bf16 input precision (tight tolerance)
    xw = jnp.einsum("si,rio->rso", x, weight)
    adj_bf = adj.astype(jnp.bfloat16).astype(jnp.float32)       # {0,1} exact
    xw_bf = xw.astype(jnp.bfloat16).astype(jnp.float32)
    ref_bf = (jnp.einsum("rds,rso->rdo", adj_bf, xw_bf) / deg).sum(axis=0) + h_bias[None, :]

    # (2) full-f32 module semantics (loose tolerance covers bf16 rounding of X@W)
    msgs = jnp.einsum("rds,si->rdi", adj, x) / deg
    ref = jnp.einsum("rdi,rio->do", msgs, weight) + h_bias[None, :]

    assert out.shape == (N, OUT_FEAT) and out.dtype == jnp.float32
    assert jnp.allclose(out, ref_bf, atol=1e-3, rtol=1e-3), "mismatch vs bf16-matched reference"
    assert jnp.allclose(out, ref, atol=5e-2, rtol=5e-2), "mismatch vs f32 module reference"
    print("KERNEL_OK")
</pallas_src>

<mosaic_0001>
module attributes {stable_mosaic.version = 11 : i64} {
  func.func @_rgcn_kernel(%arg0: i32, %arg1: i32, %arg2: i32, %arg3: memref<1x32x128xi8, #tpu.memory_space<vmem>>, %arg4: memref<1x128x128xbf16, #tpu.memory_space<vmem>>, %arg5: memref<1x32x1xf32, #tpu.memory_space<vmem>>, %arg6: memref<1x128xf32, #tpu.memory_space<vmem>>, %arg7: memref<32x128xf32, #tpu.memory_space<vmem>>, %arg8: memref<32x128xf32, #tpu.memory_space<vmem>>) attributes {dimension_semantics = [#tpu.dimension_semantics<parallel>, #tpu.dimension_semantics<arbitrary>, #tpu.dimension_semantics<arbitrary>], iteration_bounds = array<i64: 2, 3, 1>, scalar_prefetch = 0 : i64, scratch_operands = 1 : i64, tpu.core_type = #tpu.core_type<tc>, window_params = [{transform_indices = @transform_0, window_bounds = array<i64: 1, 32, 128>}, {transform_indices = @transform_1, window_bounds = array<i64: 1, 128, 128>}, {transform_indices = @transform_2, window_bounds = array<i64: 1, 32, 1>}, {pipeline_mode = #tpu.pipeline_mode<synchronous>, transform_indices = @transform_3, window_bounds = array<i64: 1, 128>}, {transform_indices = @transform_4, window_bounds = array<i64: 32, 128>}]} {
    %c0_i32 = arith.constant 0 : i32
    %0 = arith.cmpi eq, %arg1, %c0_i32 : i32
    %c0_i32_0 = arith.constant 0 : i32
    %1 = arith.cmpi eq, %arg2, %c0_i32_0 : i32
    %2 = arith.andi %0, %1 : i1
    %3 = arith.extui %2 : i1 to i32
    %c0_i32_1 = arith.constant 0 : i32
    %4 = arith.cmpi ne, %3, %c0_i32_1 : i32
    scf.if %4 {
      %cst_17 = arith.constant 0.000000e+00 : f32
      %25 = vector.broadcast %cst_17 : f32 to vector<32x128xf32>
      %c0_18 = arith.constant 0 : index
      %c0_19 = arith.constant 0 : index
      %26 = vector.load %arg7[%c0_18, %c0_19] : memref<32x128xf32, #tpu.memory_space<vmem>>, vector<32x128xf32>
      tpu.vector_store %arg7[%c0_18, %c0_19], %25 {strides = array<i32>} : memref<32x128xf32, #tpu.memory_space<vmem>>, vector<32x128xf32>,
    } else {
    }
    %c0_i32_2 = arith.constant 0 : i32
    %5 = arith.cmpi eq, %arg2, %c0_i32_2 : i32
    %6 = arith.extui %5 : i1 to i32
    %c0_i32_3 = arith.constant 0 : i32
    %7 = arith.cmpi ne, %6, %c0_i32_3 : i32
    scf.if %7 {
      %cst_17 = arith.constant 0.000000e+00 : f32
      %25 = vector.broadcast %cst_17 : f32 to vector<32x128xf32>
      %c0_18 = arith.constant 0 : index
      %c0_19 = arith.constant 0 : index
      %26 = vector.load %arg8[%c0_18, %c0_19] : memref<32x128xf32, #tpu.memory_space<vmem>>, vector<32x128xf32>
      tpu.vector_store %arg8[%c0_18, %c0_19], %25 {strides = array<i32>} : memref<32x128xf32, #tpu.memory_space<vmem>>, vector<32x128xf32>,
    } else {
    }
    %c0 = arith.constant 0 : index
    %c0_4 = arith.constant 0 : index
    %c0_5 = arith.constant 0 : index
    %8 = vector.load %arg3[%c0, %c0_4, %c0_5] : memref<1x32x128xi8, #tpu.memory_space<vmem>>, vector<1x32x128xi8>
    %9 = vector.shape_cast %8 : vector<1x32x128xi8> to vector<32x128xi8>
    %10 = arith.sitofp %9 : vector<32x128xi8> to vector<32x128xbf16>
    %c0_6 = arith.constant 0 : index
    %c0_7 = arith.constant 0 : index
    %c0_8 = arith.constant 0 : index
    %11 = vector.load %arg4[%c0_6, %c0_7, %c0_8] : memref<1x128x128xbf16, #tpu.memory_space<vmem>>, vector<1x128x128xbf16>
    %12 = vector.shape_cast %11 : vector<1x128x128xbf16> to vector<128x128xbf16>
    %c0_9 = arith.constant 0 : index
    %c0_10 = arith.constant 0 : index
    %13 = vector.load %arg8[%c0_9, %c0_10] : memref<32x128xf32, #tpu.memory_space<vmem>>, vector<32x128xf32>
    %cst = arith.constant dense<0.000000e+00> : vector<32x128xf32>
    %14 = tpu.matmul %10, %12, %cst {dimension_numbers = #tpu.dot_dimension_numbers<[1], [0], [0], [1], [0, 0, 1, 1], [], []>} : vector<32x128xbf16>, vector<128x128xbf16>, vector<32x128xf32> -> vector<32x128xf32>
    %15 = arith.addf %13, %14 : vector<32x128xf32>
    %c0_11 = arith.constant 0 : index
    %c0_12 = arith.constant 0 : index
    %16 = vector.load %arg8[%c0_11, %c0_12] : memref<32x128xf32, #tpu.memory_space<vmem>>, vector<32x128xf32>
    tpu.vector_store %arg8[%c0_11, %c0_12], %15 {strides = array<i32>} : memref<32x128xf32, #tpu.memory_space<vmem>>, vector<32x128xf32>,
    %c0_i32_13 = arith.constant 0 : i32
    %17 = arith.cmpi eq, %arg2, %c0_i32_13 : i32
    %18 = arith.extui %17 : i1 to i32
    %c0_i32_14 = arith.constant 0 : i32
    %19 = arith.cmpi ne, %18, %c0_i32_14 : i32
    scf.if %19 {
      %c0_17 = arith.constant 0 : index
      %c0_18 = arith.constant 0 : index
      %25 = vector.load %arg7[%c0_17, %c0_18] : memref<32x128xf32, #tpu.memory_space<vmem>>, vector<32x128xf32>
      %c0_19 = arith.constant 0 : index
      %c0_20 = arith.constant 0 : index
      %26 = vector.load %arg8[%c0_19, %c0_20] : memref<32x128xf32, #tpu.memory_space<vmem>>, vector<32x128xf32>
      %c0_21 = arith.constant 0 : index
      %c0_22 = arith.constant 0 : index
      %c0_23 = arith.constant 0 : index
      %27 = vector.load %arg5[%c0_21, %c0_22, %c0_23] : memref<1x32x1xf32, #tpu.memory_space<vmem>>, vector<1x32x1xf32>
      %28 = vector.shape_cast %27 : vector<1x32x1xf32> to vector<32x1xf32>
      %29 = vector.broadcast %28 : vector<32x1xf32> to vector<32x128xf32>
      %30 = arith.mulf %26, %29 : vector<32x128xf32>
      %31 = arith.addf %25, %30 : vector<32x128xf32>
      %c0_24 = arith.constant 0 : index
      %c0_25 = arith.constant 0 : index
      %32 = vector.load %arg7[%c0_24, %c0_25] : memref<32x128xf32, #tpu.memory_space<vmem>>, vector<32x128xf32>
      tpu.vector_store %arg7[%c0_24, %c0_25], %31 {strides = array<i32>} : memref<32x128xf32, #tpu.memory_space<vmem>>, vector<32x128xf32>,
    } else {
    }
    %c2_i32 = arith.constant 2 : i32
    %20 = arith.cmpi eq, %arg1, %c2_i32 : i32
    %c0_i32_15 = arith.constant 0 : i32
    %21 = arith.cmpi eq, %arg2, %c0_i32_15 : i32
    %22 = arith.andi %20, %21 : i1
    %23 = arith.extui %22 : i1 to i32
    %c0_i32_16 = arith.constant 0 : i32
    %24 = arith.cmpi ne, %23, %c0_i32_16 : i32
    scf.if %24 {
      %c0_17 = arith.constant 0 : index
      %c0_18 = arith.constant 0 : index
      %25 = vector.load %arg7[%c0_17, %c0_18] : memref<32x128xf32, #tpu.memory_space<vmem>>, vector<32x128xf32>
      %c0_19 = arith.constant 0 : index
      %c0_20 = arith.constant 0 : index
      %26 = vector.load %arg6[%c0_19, %c0_20] : memref<1x128xf32, #tpu.memory_space<vmem>>, vector<1x128xf32>
      %27 = vector.broadcast %26 : vector<1x128xf32> to vector<32x128xf32>
      %28 = arith.addf %25, %27 : vector<32x128xf32>
      %c0_21 = arith.constant 0 : index
      %c0_22 = arith.constant 0 : index
      %29 = vector.load %arg7[%c0_21, %c0_22] : memref<32x128xf32, #tpu.memory_space<vmem>>, vector<32x128xf32>
      tpu.vector_store %arg7[%c0_21, %c0_22], %28 {strides = array<i32>} : memref<32x128xf32, #tpu.memory_space<vmem>>, vector<32x128xf32>,
    } else {
    }
    return
  }
  func.func @transform_0(%arg0: i32, %arg1: i32, %arg2: i32) -> (i32, i32, i32) {
    %c0_i32 = arith.constant 0 : i32
    return %arg1, %arg0, %arg2 : i32, i32, i32
  }
  func.func @transform_1(%arg0: i32, %arg1: i32, %arg2: i32) -> (i32, i32, i32) {
    %c0_i32 = arith.constant 0 : i32
    %c0_i32_0 = arith.constant 0 : i32
    return %arg1, %arg2, %c0_i32 : i32, i32, i32
  }
  func.func @transform_2(%arg0: i32, %arg1: i32, %arg2: i32) -> (i32, i32, i32) {
    %c0_i32 = arith.constant 0 : i32
    %c0_i32_0 = arith.constant 0 : i32
    return %arg1, %arg0, %c0_i32 : i32, i32, i32
  }
  func.func @transform_3(%arg0: i32, %arg1: i32, %arg2: i32) -> (i32, i32) {
    %c0_i32 = arith.constant 0 : i32
    %c0_i32_0 = arith.constant 0 : i32
    %c0_i32_1 = arith.constant 0 : i32
    return %c0_i32, %c0_i32_0 : i32, i32
  }
  func.func @transform_4(%arg0: i32, %arg1: i32, %arg2: i32) -> (i32, i32) {
    %c0_i32 = arith.constant 0 : i32
    %c0_i32_0 = arith.constant 0 : i32
    return %arg0, %c0_i32 : i32, i32
  }
}

</mosaic_0001>

<bundles_post_ra>
// kernel: rel_graph_conv_basis.1
= control target key start
LH: loop header
LB: loop body
LE: loop exit
PB: predicated region body
PF: predicated region fallthrough
CT: control target
= control target key end

     0   :  { %s800_s15 = smov 0   ;;  %s802_s16 = smov 0   ;;  %s910_s0 = inlined_call_operand.vmem [shape: s8[3,64,128], index: 0, kind: input, shape index: {}]   ;;  %s911_s1 = inlined_call_operand.vmem [shape: bf16[3,128,128], index: 1, kind: input, shape index: {}]   ;;  %s912_s2 = inlined_call_operand.vmem [shape: f32[3,64,1], index: 2, kind: input, shape index: {}]   ;;  %s913_s3 = inlined_call_operand.vmem [shape: f32[1,128], index: 3, kind: input, shape index: {}]   ;;  %s914_s4 = inlined_call_operand.vmem [shape: f32[64,128], index: 4, kind: output, shape index: {}]  }
   0x1   :  { %s804_s17 = smov 0   ;;  %s806_s18 = smov 0  }
   0x2   :  { %s808_s19 = smov 0  }
   0x3 LB: > { %s29_s20 = sadd.s32 1, %s763_s17  ;;  %s33_s21 = sadd.s32 1, %s767_s18  ;;  %s771_s19 = sphi %s808_s19, %s14_s19   ;;  %s767_s18 = sphi %s806_s18, %s918_s18   ;;  %s763_s17 = sphi %s804_s17, %s917_s17   ;;  %s759_s16 = sphi %s802_s16, %s916_s16   ;;  %s755_s15 = sphi %s800_s15, %s915_s15  }
   0x4   : > { %p31_p0 = scmp.ge.s32.totalorder %s29_s20, 3  ;;  %p623_p1 = scmp.ge.s32.totalorder %s771_s19, 1 }
   0x5   : > { %p225_p2 = scmp.lt.s32.totalorder %s771_s19, 7 }
   0x6   : > { %s920_s20 = smov (%p31_p0, %s29_s20), 0  ;;  %s922_s21 = smov (!%p31_p0, %s33_s21), %s767_s18 }
   0x7   : > { %p226_p3 = pnand %p623_p1, %p225_p2  ;;  %p35_p4 = scmp.ge.s32.totalorder %s922_s21, 2 }
   0x8   : > { %p275_p5 = scmp.lt.s32.totalorder (!%p226_p3), %s755_s15, 2  ;;  %p277_p6 = scmp.lt.s32.totalorder (!%p226_p3), %s759_s16, 1 }
   0x9   : > { %s924_s21 = smov (%p35_p4, %s922_s21), 0  ;;  %229 = sbr.rel (%p226_p3) target bundleno = 209 (0xd1), region = 36 }
   0xa   : > { %s628_s22 = sshll.u32 (!%p226_p3), %s759_s16, 2  ;;  %p312_p7 = scmp.eq.s32.totalorder (!%p226_p3), %s755_s15, 0 }
   0xb   : > { %p299_p8 = scmp.lt.s32.totalorder (!%p226_p3), %s628_s22, 7 }
   0xe   : > { %s276_s23 = scalar_select %p275_p5, %s755_s15, 2  ;;  %v773_v0 = vmov (%p312_p7), 0.0  }
   0xf   : > { %s926_s16 = smov (!%p277_p6, %s759_s16), 1  ;;  %s928_s22 = smov (!%p299_p8, %s628_s22), 7 }
  0x10   : > { %s624_s24 = sshll.u32 %s276_s23, 1  ;;  %s669_s25 = sshll.u32 %s276_s23, 6 }
  0x11   : > { %s283_s26 = sadd.s32 %s624_s24, %s926_s16  ;;  %s843_s29 = scalar_lea.vmem %s911_s1, %s669_s25 }
  0x12   : > { %s625_s30 = sshll.u32 %s283_s26, 3  ;;  %s629_s8 = sshll.u32 %s276_s23, 3 }
  0x13   : > { %s848_s7 = scalar_lea.vmem %s910_s0, %s625_s30  ;;  %s302_s9 = sadd.s32 %s629_s8, %s928_s22 }
  0x14   : > { %s632_s10 = sshll.u32 %s928_s22, 3  ;;  %s630_s11 = sshll.u32 %s302_s9, 3 }
  0x15   : > { %s853_s14 = scalar_lea.vmem %s914_s4, %s632_s10  ;;  %s304_s25 = scalar_lea.vmem %s912_s2, %s630_s11 }
  0x16   : > { %317 = sbr.rel (!%p312_p7) target bundleno = 27 (0x1b), region = 40  ;;  %318 = vst [vmem:[%s853_s14] sm:$0xff] (%p312_p7), %v773_v0 }
  0x17   : > { %319 = vst [vmem:[%s853_s14 + $0x8] sm:$0xff] (%p312_p7), %v773_v0 }
  0x18   : > { %320 = vst [vmem:[%s853_s14 + $0x10] sm:$0xff] (%p312_p7), %v773_v0 }
  0x19   : > { %321 = vst [vmem:[%s853_s14 + $0x18] sm:$0xff] (%p312_p7), %v773_v0 }
  0x1b PF: > { %v678_v1 = vld [vmem:[%s843_s29 + $0x38] sm:$0xff]  ;;  %v677_v2 = vld [vmem:[%s843_s29 + $0x30] sm:$0xff]  ;;  %v774_v3 = vmov 0   ;;  %v446_v4 = vld [vmem:[%s304_s25] sm:$0xff]  ;;  %p482_p9 = scmp.eq.s32.totalorder %s755_s15, 2 }
  0x1c   : > { %408 = vmatpush.bf16.msra.mxu0 %v678_v1  ;;  %680 = vmatpush.bf16.msra.mxu1 %v678_v1  ;;  %v448_v5 = vld [vmem:[%s304_s25 + $0x10] sm:$0xff]  ;;  %v676_v6 = vld [vmem:[%s843_s29 + $0x28] sm:$0xff]  ;;  %v449_v8 = vld [vmem:[%s304_s25 + $0x18] sm:$0xff] }
  0x1d   : > { %730 = vset.pattern.permute.xlu0 %v774_v3  ;;  %731 = vset.pattern.permute.xlu1 %v774_v3  ;;  %v447_v7 = vld [vmem:[%s304_s25 + $0x8] sm:$0xff]  ;;  %v675_v9 = vld [vmem:[%s843_s29 + $0x20] sm:$0xff]  ;;  %v674_v10 = vld [vmem:[%s843_s29 + $0x18] sm:$0xff] }
  0x1e   : > { %452 = vperm.xlu0 %730, %v446_v4   ;;  %462 = vperm.xlu1 %731, %v448_v5   ;;  %v673_v11 = vld [vmem:[%s843_s29 + $0x10] sm:$0xff]  ;;  %v329_v12 = vld [vmem:[%s848_s7] sm:$0xff]  ;;  %v672_v17 = vld [vmem:[%s843_s29 + $0x8] sm:$0xff] }
  0x1f   : > { %v330_v13 = vunpack.c.0.s8 %v329_v12  ;;  %v331_v14 = vunpack.c.1.s8 %v329_v12  ;;  %v332_v15 = vunpack.c.2.s8 %v329_v12  ;;  %v333_v16 = vunpack.c.3.s8 %v329_v12  ;;  %v671_v22 = vld [vmem:[%s843_s29] sm:$0xff]  ;;  %v440_v31 = vld [vmem:[%s853_s14 + $0x10] sm:$0xff]  ;;  %v439_v32 = vld [vmem:[%s853_s14 + $0x8] sm:$0xff] }
  0x20   : > { %409 = vmatpush.bf16.msra.mxu0 %v677_v2  ;;  %681 = vmatpush.bf16.msra.mxu1 %v677_v2  ;;  %v438_v28 = vld [vmem:[%s853_s14] sm:$0xff]  ;;  %v441_v33 = vld [vmem:[%s853_s14 + $0x18] sm:$0xff] }
  0x21   : > { %v334_v18 = vcvt.s32.f32 %v330_v13  ;;  %v335_v19 = vcvt.s32.f32 %v331_v14  ;;  %v336_v20 = vcvt.s32.f32 %v332_v15  ;;  %v337_v21 = vcvt.s32.f32 %v333_v16  ;;  %v732_v49 = vld [vmem:[%s913_s3] ss:$0 sm:$0xff] (%p482_p9) }
  0x23   : > { %v338_v23 = vpack.c.bf16 %v335_v19, %v334_v18  ;;  %v339_v24 = vpack.c.bf16 %v337_v21, %v336_v20 }
  0x24   : > { %410 = vmatpush.bf16.msra.mxu0 %v676_v6  ;;  %682 = vmatpush.bf16.msra.mxu1 %v676_v6 }
  0x26   : > { %457 = vperm.xlu0 %730, %v447_v7   ;;  %467 = vperm.xlu1 %731, %v449_v8  }
  0x28   : > { %411 = vmatpush.bf16.msra.mxu0 %v675_v9  ;;  %683 = vmatpush.bf16.msra.mxu1 %v675_v9 }
  0x2c   : > { %412 = vmatpush.bf16.msra.mxu0 %v674_v10  ;;  %684 = vmatpush.bf16.msra.mxu1 %v674_v10 }
  0x30   : > { %413 = vmatpush.bf16.msra.mxu0 %v673_v11  ;;  %685 = vmatpush.bf16.msra.mxu1 %v673_v11 }
  0x34   : > { %414 = vmatpush.bf16.msra.mxu0 %v672_v17  ;;  %686 = vmatpush.bf16.msra.mxu1 %v672_v17 }
  0x38   : > { %415 = vmatpush.bf16.msra.mxu0 %v671_v22  ;;  %687 = vmatpush.bf16.msra.mxu1 %v671_v22 }
  0x3b   : > { %416 = vmatmul.bf16.vlgmr.msra.gmra.mxu0 %v338_v23  ;;  %421 = vmatmul.bf16.vlgmr.msra.gmra.mxu1 %v339_v24 }
  0x90   : > { %v453_v25 = vpop.permute.xlu0 %452  ;;  %v463_v26 = vpop.permute.xlu1 %462 }
  0x98   : > { %v458_v35 = vpop.permute.xlu0 %457  ;;  %v468_v36 = vpop.permute.xlu1 %467 }
  0xb8   : > { %v417_v27 = vpop.f32.mrf.mxu0  ;;  %v422_v29 = vpop.f32.mrf.mxu1 }
  0xb9   : > { %v470_v30 = vmul.f32 %v453_v25, %v417_v27  ;;  %v472_v37 = vmul.f32 %v463_v26, %v422_v29 }
  0xbb   : > { %v474_v34 = vadd.f32 %v470_v30, %v438_v28  ;;  %v476_v43 = vadd.f32 %v472_v37, %v440_v31 }
  0xbd   : > { %478 = vst [vmem:[%s853_s14] sm:$0xff] %v474_v34 }
  0xbe   : > { %480 = vst [vmem:[%s853_s14 + $0x10] sm:$0xff] %v476_v43 }
  0xc0   : > { %v419_v38 = vpop.f32.mrf.mxu0  ;;  %v424_v39 = vpop.f32.mrf.mxu1 }
  0xc1   : > { %v471_v40 = vmul.f32 %v458_v35, %v419_v38  ;;  %v473_v41 = vmul.f32 %v468_v36, %v424_v39 }
  0xc2   : > { %486 = sbr.rel (!%p482_p9) target bundleno = 209 (0xd1), region = 52 }
  0xc3   : > { %v475_v42 = vadd.f32 %v471_v40, %v439_v32  ;;  %v477_v44 = vadd.f32 %v473_v41, %v441_v33 }
  0xc4   : > { %v487_v45 = vld [vmem:[%s853_s14] sm:$0xff] (%p482_p9) }
  0xc5   : > { %479 = vst [vmem:[%s853_s14 + $0x8] sm:$0xff] %v475_v42  ;;  %v489_v47 = vld [vmem:[%s853_s14 + $0x10] sm:$0xff] (%p482_p9)  ;;  %v495_v50 = vadd.f32 (%p482_p9), %v732_v49, %v487_v45 }
  0xc6   : > { %481 = vst [vmem:[%s853_s14 + $0x18] sm:$0xff] %v477_v44  ;;  %v497_v52 = vadd.f32 (%p482_p9), %v732_v49, %v489_v47 }
  0xc7   : > { %499 = vst [vmem:[%s853_s14] sm:$0xff] %v495_v50 }
  0xc8   : > { %501 = vst [vmem:[%s853_s14 + $0x10] sm:$0xff] %v497_v52 }
  0xcc   : > { %v488_v46 = vld [vmem:[%s853_s14 + $0x8] sm:$0xff] }
  0xcd   : > { %v490_v48 = vld [vmem:[%s853_s14 + $0x18] sm:$0xff]  ;;  %v496_v51 = vadd.f32 %v732_v49, %v488_v46 }
  0xce   : > { %v498_v53 = vadd.f32 %v732_v49, %v490_v48 }
  0xcf   : > { %500 = vst [vmem:[%s853_s14 + $0x8] sm:$0xff] %v496_v51 }
  0xd0   : > { %502 = vst [vmem:[%s853_s14 + $0x18] sm:$0xff] %v498_v53 }
  0xd1 PF: > { %s14_s19 = sadd.s32 1, %s771_s19   ;;  %s915_s15 = smov %s763_s17 }
  0xd2   : > { %p11_p10 = scmp.ge.s32.totalorder %s14_s19, 8   ;;  %s916_s16 = smov %s767_s18 }
  0xd3   : > { %s917_s17 = smov %s920_s20  ;;  %s918_s18 = smov %s924_s21 }
  0xd4   :  { %13 = sbr.rel (!%p11_p10) target bundleno = 3 (0x3), region = 88 }

</bundles_post_ra>
